<compile_context>
chip_gen: v7x
topology: tpu7x:2x2x1
jax: 0.10.0
libtpu: 0.0.40
codegen_flags: <defaults>
</compile_context>

<pallas_src>
import math
import functools

import jax
import jax.numpy as jnp
from jax import lax
from jax.experimental import pallas as pl
from jax.experimental.pallas import tpu as pltpu

_INV_SQRT2 = 1.0 / math.sqrt(2.0)


def _round_up(n, m):
    return ((n + m - 1) // m) * m


def _vmem_limit(estimate_bytes):
    """Scoped-VMEM limit: generous on 128 MiB chips (v5e/v6e), tighter on v7x (64 MiB)."""
    try:
        cap = int(pltpu.get_tpu_info().vmem_capacity_bytes)
    except Exception:
        cap = 64 * 2**20                       # conservative fallback (v7x-safe)
    cap = max(int(cap * 0.8), 32 * 2**20)      # leave headroom for the compiler
    want = max(int(1.5 * estimate_bytes), 32 * 2**20)
    return int(min(want, cap))


def _const_spec(shape):
    """BlockSpec for an operand whose block index never changes: single-buffered."""
    return pl.BlockSpec(shape, lambda *_: (0,) * len(shape),
                        pipeline_mode=pl.Buffered(1))


# ---------------------------------------------------------------------------
# Attention sublayer kernel: grid = (batch, head); heads accumulate into a
# f32 VMEM scratch, residual + LayerNorm run on the last head.
# ---------------------------------------------------------------------------
def _attn_kernel(x_ref, m_ref, wqkv_ref, bqkv_ref, wo_ref, bo_ref, g_ref, b_ref,
                 o_ref, acc_ref, *, eps):
    h = pl.program_id(1)

    @pl.when(h == 0)
    def _():
        acc_ref[...] = jnp.zeros_like(acc_ref)

    xb = x_ref[0].astype(jnp.bfloat16)                              # (S, E)

    # Per-head Q/K/V projections (1/sqrt(dh) already folded into the Q slab).
    q = jnp.dot(xb, wqkv_ref[0, 0], preferred_element_type=jnp.float32) + bqkv_ref[0, 0]
    k = jnp.dot(xb, wqkv_ref[0, 1], preferred_element_type=jnp.float32) + bqkv_ref[0, 1]
    v = jnp.dot(xb, wqkv_ref[0, 2], preferred_element_type=jnp.float32) + bqkv_ref[0, 2]

    # scores = q @ k^T  (contract head_dim, no explicit transpose)
    s = lax.dot_general(q.astype(jnp.bfloat16), k.astype(jnp.bfloat16),
                        (((1,), (1,)), ((), ())),
                        preferred_element_type=jnp.float32)         # (S, S)
    s = s + m_ref[0]                                                # additive key mask (1, S)
    s = s - jnp.max(s, axis=-1, keepdims=True)
    p = jnp.exp(s)
    l = jnp.sum(p, axis=-1, keepdims=True)

    ctx = jnp.dot(p.astype(jnp.bfloat16), v.astype(jnp.bfloat16),
                  preferred_element_type=jnp.float32)                # (S, dh)
    ctx = ctx * pl.reciprocal(l, approx=True)                        # normalize (S,dh), not (S,S)

    acc_ref[...] += jnp.dot(ctx.astype(jnp.bfloat16), wo_ref[0],
                            preferred_element_type=jnp.float32)      # (S, E)

    @pl.when(h == pl.num_programs(1) - 1)
    def _():
        z = x_ref[0].astype(jnp.float32) + acc_ref[...] + bo_ref[...]
        mean = jnp.mean(z, axis=-1, keepdims=True)
        var = jnp.mean(jnp.square(z - mean), axis=-1, keepdims=True)
        o = (z - mean) * lax.rsqrt(var + eps) * g_ref[...] + b_ref[...]
        o_ref[0] = o.astype(o_ref.dtype)


def attention_pallas(x, mask3, lp, *, eps=1e-12, out_dtype=jnp.bfloat16):
    """x: (B,S,E); mask3: (B,1,S) additive key mask; lp: prepared layer params."""
    B, S, E = x.shape
    H, _, _, dh = lp["wqkv"].shape

    est = (2 * S * E * 4                         # x tile, double-buffered (f32 worst case)
           + 2 * S * E * 2                       # out tile, double-buffered (bf16)
           + 2 * (3 * E * dh + dh * E) * 2       # per-head weight slabs, double-buffered bf16
           + S * E * 4                           # f32 accumulator scratch
           + (3 * S * dh + 2 * S * S + 2 * S * E) * 4)   # in-kernel temporaries

    out = pl.pallas_call(
        functools.partial(_attn_kernel, eps=eps),
        out_shape=jax.ShapeDtypeStruct((B, S, E), out_dtype),
        grid_spec=pltpu.PrefetchScalarGridSpec(
            num_scalar_prefetch=0,
            grid=(B, H),
            in_specs=[
                pl.BlockSpec((1, S, E), lambda b, h: (b, 0, 0)),          # x (resident per batch)
                pl.BlockSpec((1, 1, S), lambda b, h: (b, 0, 0)),          # additive mask
                pl.BlockSpec((1, 3, E, dh), lambda b, h: (h, 0, 0, 0)),   # packed Q|K|V weights
                pl.BlockSpec((1, 3, 1, dh), lambda b, h: (h, 0, 0, 0)),   # packed Q|K|V biases
                pl.BlockSpec((1, dh, E), lambda b, h: (h, 0, 0)),         # per-head Wo slab
                _const_spec((1, E)),                                      # bo
                _const_spec((1, E)),                                      # gamma
                _const_spec((1, E)),                                      # beta
            ],
            out_specs=pl.BlockSpec((1, S, E), lambda b, h: (b, 0, 0)),
            scratch_shapes=[pltpu.VMEM((S, E), jnp.float32)],
        ),
        compiler_params=pltpu.CompilerParams(
            dimension_semantics=("parallel", "arbitrary"),
            vmem_limit_bytes=_vmem_limit(est)),
    )(x, mask3, lp["wqkv"], lp["bqkv"], lp["wo"], lp["bo"], lp["ln1_g"], lp["ln1_b"])
    return out


# ---------------------------------------------------------------------------
# FFN sublayer kernel: row-tiled over the flattened (B*S, E) token slab.
# ---------------------------------------------------------------------------
def _ffn_kernel(x_ref, w1_ref, b1_ref, w2_ref, b2_ref, g_ref, b_ref, o_ref, *, eps):
    x = x_ref[...].astype(jnp.float32)                              # (tm, E) residual in f32

    h = jnp.dot(x.astype(jnp.bfloat16), w1_ref[...],
                preferred_element_type=jnp.float32) + b1_ref[...]
    h = h * 0.5 * (1.0 + lax.erf(h * _INV_SQRT2))                   # erf-gelu (matches torch)

    y = jnp.dot(h.astype(jnp.bfloat16), w2_ref[...],
                preferred_element_type=jnp.float32) + b2_ref[...]

    z = x + y
    mean = jnp.mean(z, axis=-1, keepdims=True)
    var = jnp.mean(jnp.square(z - mean), axis=-1, keepdims=True)
    o_ref[...] = ((z - mean) * lax.rsqrt(var + eps) * g_ref[...] + b_ref[...]).astype(o_ref.dtype)


def ffn_pallas(x, lp, *, eps=1e-12, row_tile=None, out_dtype=jnp.bfloat16):
    B, S, E = x.shape
    I = lp["w1"].shape[1]
    N = B * S

    if row_tile is None:
        # Prefer a tile that divides N exactly (no pad/slice round-trips);
        # 512 amortizes per-grid-step overhead on v5e/v6e/v7x.
        row_tile = next((t for t in (512, 256, 128, 64, 32, 16, 8)
                         if t <= N and N % t == 0), min(N, 512))
    row_tile = max(1, min(row_tile, N))

    x2d = x.reshape(N, E)
    Np = N
    if N % row_tile != 0:
        # TODO(synk): masked last tile (pl.when + pltpu.store mask) instead of padding.
        row_tile = max(8, _round_up(row_tile, 8))
        Np = _round_up(N, row_tile)
        x2d = jnp.pad(x2d, ((0, Np - N), (0, 0)))

    est = (2 * row_tile * E * 4 + 2 * row_tile * E * 2    # io tiles (double-buffered)
           + (E * I + I * E) * 2 + (I + 3 * E) * 4        # single-buffered bf16 weights + consts
           + 2 * row_tile * I * 4 + 2 * row_tile * E * 4) # hidden activation + temporaries

    out2d = pl.pallas_call(
        functools.partial(_ffn_kernel, eps=eps),
        out_shape=jax.ShapeDtypeStruct((Np, E), out_dtype),
        grid_spec=pltpu.PrefetchScalarGridSpec(
            num_scalar_prefetch=0,
            grid=(Np // row_tile,),
            in_specs=[
                pl.BlockSpec((row_tile, E), lambda i: (i, 0)),     # x tile (pipelined)
                _const_spec((E, I)),                               # W1 (bf16, resident)
                _const_spec((1, I)),                               # b1
                _const_spec((I, E)),                               # W2 (bf16, resident)
                _const_spec((1, E)),                               # b2
                _const_spec((1, E)),                               # gamma
                _const_spec((1, E)),                               # beta
            ],
            out_specs=pl.BlockSpec((row_tile, E), lambda i: (i, 0)),
        ),
        compiler_params=pltpu.CompilerParams(
            dimension_semantics=("parallel",),
            vmem_limit_bytes=_vmem_limit(est)),
    )(x2d, lp["w1"], lp["b1"], lp["w2"], lp["b2"], lp["ln2_g"], lp["ln2_b"])

    if Np != N:
        out2d = out2d[:N]
    return out2d.reshape(B, S, E)


# ---------------------------------------------------------------------------
# One-time parameter packing: per-head Q|K|V/Wo slabs (head index on a leading
# dim), 1/sqrt(dh) folded into Q, bf16 casts done once (not per layer call).
# ---------------------------------------------------------------------------
def prepare_encoder_params(params, *, n_heads):
    prepared = []
    for p in params:
        E = p["wq"].shape[0]
        dh = E // n_heads
        inv_scale = 1.0 / math.sqrt(dh)
        heads = lambda w: w.reshape(E, n_heads, dh).transpose(1, 0, 2)      # (H, E, dh)
        wqkv = jnp.stack([heads(p["wq"] * inv_scale), heads(p["wk"]), heads(p["wv"])],
                         axis=1).astype(jnp.bfloat16)                       # (H, 3, E, dh)
        bqkv = jnp.stack([(p["bq"] * inv_scale).reshape(n_heads, 1, dh),
                          p["bk"].reshape(n_heads, 1, dh),
                          p["bv"].reshape(n_heads, 1, dh)],
                         axis=1).astype(jnp.float32)                        # (H, 3, 1, dh)
        row = lambda v: v.reshape(1, -1).astype(jnp.float32)
        prepared.append(dict(
            wqkv=wqkv, bqkv=bqkv,
            wo=p["wo"].reshape(n_heads, dh, E).astype(jnp.bfloat16),        # (H, dh, E)
            bo=row(p["bo"]), ln1_g=row(p["ln1_g"]), ln1_b=row(p["ln1_b"]),
            w1=p["w1"].astype(jnp.bfloat16), b1=row(p["b1"]),
            w2=p["w2"].astype(jnp.bfloat16), b2=row(p["b2"]),
            ln2_g=row(p["ln2_g"]), ln2_b=row(p["ln2_b"])))
    return prepared


# ---------------------------------------------------------------------------
# Full encoder: attention sublayer then FFN sublayer per layer; activations are
# carried bf16 between kernels, the final layer emits the input dtype.
# ---------------------------------------------------------------------------
def transformer_encoder_pallas(x, mask, prepared_params, *, eps=1e-12, ffn_row_tile=None):
    B, S, E = x.shape
    mask3 = mask.reshape(B, 1, S).astype(jnp.float32)
    out = x
    n = len(prepared_params)
    for i, lp in enumerate(prepared_params):
        a = attention_pallas(out, mask3, lp, eps=eps, out_dtype=jnp.bfloat16)
        out = ffn_pallas(a, lp, eps=eps, row_tile=ffn_row_tile,
                         out_dtype=(x.dtype if i == n - 1 else jnp.bfloat16))
    return out


# ---------------------------------------------------------------------------
# Pure-JAX f32 reference (mirrors the PyTorch module, eval mode).
# ---------------------------------------------------------------------------
def _reference_encoder(x, mask, params, *, n_heads, eps=1e-12):
    def ln(z, g, b):
        mean = jnp.mean(z, -1, keepdims=True)
        var = jnp.mean(jnp.square(z - mean), -1, keepdims=True)
        return (z - mean) * lax.rsqrt(var + eps) * g + b

    out = x.astype(jnp.float32)
    B, S, E = x.shape
    dh = E // n_heads
    for p in params:
        q = out @ p["wq"] + p["bq"]
        k = out @ p["wk"] + p["bk"]
        v = out @ p["wv"] + p["bv"]
        qh = q.reshape(B, S, n_heads, dh).transpose(0, 2, 1, 3)
        kh = k.reshape(B, S, n_heads, dh).transpose(0, 2, 1, 3)
        vh = v.reshape(B, S, n_heads, dh).transpose(0, 2, 1, 3)
        s = jnp.einsum("bhqd,bhkd->bhqk", qh, kh) / math.sqrt(dh)
        s = s + mask[:, None, None, :]
        pr = jax.nn.softmax(s, axis=-1)
        ctx = jnp.einsum("bhqk,bhkd->bhqd", pr, vh)
        ctx = ctx.transpose(0, 2, 1, 3).reshape(B, S, E)
        a = ln(out + ctx @ p["wo"] + p["bo"], p["ln1_g"], p["ln1_b"])
        h = a @ p["w1"] + p["b1"]
        h = h * 0.5 * (1.0 + lax.erf(h / math.sqrt(2.0)))
        out = ln(a + h @ p["w2"] + p["b2"], p["ln2_g"], p["ln2_b"])
    return out


def _linear_params(key, fan_in, fan_out):
    kw, kb = jax.random.split(key)
    lim = 1.0 / math.sqrt(fan_in)
    w = jax.random.uniform(kw, (fan_in, fan_out), minval=-lim, maxval=lim,
                           dtype=jnp.float32)            # = torch weight.T
    b = jax.random.uniform(kb, (fan_out,), minval=-lim, maxval=lim,
                           dtype=jnp.float32)
    return w, b


if __name__ == "__main__":
    # Small shapes matching the module defaults.
    batch, seq = 2, 8
    n_layers, n_heads, emb_dim, inter_size = 2, 2, 64, 256
    eps = 1e-12

    key = jax.random.PRNGKey(0)
    key, kx = jax.random.split(key)
    x = jax.random.normal(kx, (batch, seq, emb_dim), dtype=jnp.float32)

    # Additive key mask (0 = attend, -10000 = masked), like BERT's extended mask.
    lengths = jnp.array([seq, seq - 3])
    mask = jnp.where(jnp.arange(seq)[None, :] < lengths[:, None],
                     0.0, -10000.0).astype(jnp.float32)

    params = []
    for _ in range(n_layers):
        key, kq, kk, kv, ko, k1, k2 = jax.random.split(key, 7)
        wq, bq = _linear_params(kq, emb_dim, emb_dim)
        wk, bk = _linear_params(kk, emb_dim, emb_dim)
        wv, bv = _linear_params(kv, emb_dim, emb_dim)
        wo, bo = _linear_params(ko, emb_dim, emb_dim)
        w1, b1 = _linear_params(k1, emb_dim, inter_size)
        w2, b2 = _linear_params(k2, inter_size, emb_dim)
        params.append(dict(
            wq=wq, bq=bq, wk=wk, bk=bk, wv=wv, bv=bv, wo=wo, bo=bo,
            ln1_g=jnp.ones((emb_dim,), jnp.float32),
            ln1_b=jnp.zeros((emb_dim,), jnp.float32),
            w1=w1, b1=b1, w2=w2, b2=b2,
            ln2_g=jnp.ones((emb_dim,), jnp.float32),
            ln2_b=jnp.zeros((emb_dim,), jnp.float32)))

    prepared = prepare_encoder_params(params, n_heads=n_heads)   # one-time pack/cast

    out = transformer_encoder_pallas(x, mask, prepared, eps=eps,
                                     ffn_row_tile=8)   # tiny demo -> 2-step FFN grid
    out = jax.block_until_ready(out)

    ref = _reference_encoder(x, mask, params, n_heads=n_heads, eps=eps)
    assert out.shape == (batch, seq, emb_dim)
    max_err = float(jnp.max(jnp.abs(out.astype(jnp.float32) - ref)))
    # bf16 MXU operands + bf16 inter-kernel activations (f32 accumulation/LayerNorm)
    # introduce small drift vs the f32 reference.
    assert max_err < 5e-2, f"mismatch vs reference, max |diff| = {max_err}"

    print("KERNEL_OK")
</pallas_src>

<mosaic_0001>
module attributes {stable_mosaic.version = 11 : i64} {
  func.func @_attn_kernel(%arg0: i32, %arg1: i32, %arg2: memref<1x8x64xf32, #tpu.memory_space<vmem>>, %arg3: memref<1x1x8xf32, #tpu.memory_space<vmem>>, %arg4: memref<1x3x64x32xbf16, #tpu.memory_space<vmem>>, %arg5: memref<1x3x1x32xf32, #tpu.memory_space<vmem>>, %arg6: memref<1x32x64xbf16, #tpu.memory_space<vmem>>, %arg7: memref<1x64xf32, #tpu.memory_space<vmem>>, %arg8: memref<1x64xf32, #tpu.memory_space<vmem>>, %arg9: memref<1x64xf32, #tpu.memory_space<vmem>>, %arg10: memref<1x8x64xbf16, #tpu.memory_space<vmem>>, %arg11: memref<8x64xf32, #tpu.memory_space<vmem>>) attributes {dimension_semantics = [#tpu.dimension_semantics<parallel>, #tpu.dimension_semantics<arbitrary>], iteration_bounds = array<i64: 2, 2>, scalar_prefetch = 0 : i64, scratch_operands = 1 : i64, tpu.core_type = #tpu.core_type<tc>, window_params = [{transform_indices = @transform_0, window_bounds = array<i64: 1, 8, 64>}, {transform_indices = @transform_1, window_bounds = array<i64: 1, 1, 8>}, {transform_indices = @transform_2, window_bounds = array<i64: 1, 3, 64, 32>}, {transform_indices = @transform_3, window_bounds = array<i64: 1, 3, 1, 32>}, {transform_indices = @transform_4, window_bounds = array<i64: 1, 32, 64>}, {pipeline_mode = #tpu.pipeline_mode<synchronous>, transform_indices = @transform_5, window_bounds = array<i64: 1, 64>}, {pipeline_mode = #tpu.pipeline_mode<synchronous>, transform_indices = @transform_6, window_bounds = array<i64: 1, 64>}, {pipeline_mode = #tpu.pipeline_mode<synchronous>, transform_indices = @transform_7, window_bounds = array<i64: 1, 64>}, {transform_indices = @transform_8, window_bounds = array<i64: 1, 8, 64>}]} {
    %c0_i32 = arith.constant 0 : i32
    %0 = arith.cmpi eq, %arg1, %c0_i32 : i32
    %1 = arith.extui %0 : i1 to i32
    %c0_i32_0 = arith.constant 0 : i32
    %2 = arith.cmpi ne, %1, %c0_i32_0 : i32
    scf.if %2 {
      %cst_43 = arith.constant 0.000000e+00 : f32
      %57 = vector.broadcast %cst_43 : f32 to vector<8x64xf32>
      %c0_44 = arith.constant 0 : index
      %c0_45 = arith.constant 0 : index
      %58 = vector.load %arg11[%c0_44, %c0_45] : memref<8x64xf32, #tpu.memory_space<vmem>>, vector<8x64xf32>
      tpu.vector_store %arg11[%c0_44, %c0_45], %57 {strides = array<i32>} : memref<8x64xf32, #tpu.memory_space<vmem>>, vector<8x64xf32>,
    } else {
    }
    %c0 = arith.constant 0 : index
    %c0_1 = arith.constant 0 : index
    %c0_2 = arith.constant 0 : index
    %3 = vector.load %arg2[%c0, %c0_1, %c0_2] : memref<1x8x64xf32, #tpu.memory_space<vmem>>, vector<1x8x64xf32>
    %4 = vector.shape_cast %3 : vector<1x8x64xf32> to vector<8x64xf32>
    %5 = arith.truncf %4 : vector<8x64xf32> to vector<8x64xbf16>
    %c0_3 = arith.constant 0 : index
    %c0_4 = arith.constant 0 : index
    %c0_5 = arith.constant 0 : index
    %c0_6 = arith.constant 0 : index
    %6 = vector.load %arg4[%c0_3, %c0_4, %c0_5, %c0_6] : memref<1x3x64x32xbf16, #tpu.memory_space<vmem>>, vector<1x1x64x32xbf16>
    %7 = vector.shape_cast %6 : vector<1x1x64x32xbf16> to vector<64x32xbf16>
    %cst = arith.constant dense<0.000000e+00> : vector<8x32xf32>
    %8 = tpu.matmul %5, %7, %cst {dimension_numbers = #tpu.dot_dimension_numbers<[1], [0], [0], [1], [0, 0, 1, 1], [], []>} : vector<8x64xbf16>, vector<64x32xbf16>, vector<8x32xf32> -> vector<8x32xf32>
    %c0_7 = arith.constant 0 : index
    %c0_8 = arith.constant 0 : index
    %c0_9 = arith.constant 0 : index
    %c0_10 = arith.constant 0 : index
    %9 = vector.load %arg5[%c0_7, %c0_8, %c0_9, %c0_10] : memref<1x3x1x32xf32, #tpu.memory_space<vmem>>, vector<1x1x1x32xf32>
    %10 = vector.shape_cast %9 : vector<1x1x1x32xf32> to vector<1x32xf32>
    %11 = vector.broadcast %10 : vector<1x32xf32> to vector<8x32xf32>
    %12 = arith.addf %8, %11 : vector<8x32xf32>
    %c0_11 = arith.constant 0 : index
    %c1 = arith.constant 1 : index
    %c0_12 = arith.constant 0 : index
    %c0_13 = arith.constant 0 : index
    %13 = vector.load %arg4[%c0_11, %c1, %c0_12, %c0_13] : memref<1x3x64x32xbf16, #tpu.memory_space<vmem>>, vector<1x1x64x32xbf16>
    %14 = vector.shape_cast %13 : vector<1x1x64x32xbf16> to vector<64x32xbf16>
    %cst_14 = arith.constant dense<0.000000e+00> : vector<8x32xf32>
    %15 = tpu.matmul %5, %14, %cst_14 {dimension_numbers = #tpu.dot_dimension_numbers<[1], [0], [0], [1], [0, 0, 1, 1], [], []>} : vector<8x64xbf16>, vector<64x32xbf16>, vector<8x32xf32> -> vector<8x32xf32>
    %c0_15 = arith.constant 0 : index
    %c1_16 = arith.constant 1 : index
    %c0_17 = arith.constant 0 : index
    %c0_18 = arith.constant 0 : index
    %16 = vector.load %arg5[%c0_15, %c1_16, %c0_17, %c0_18] : memref<1x3x1x32xf32, #tpu.memory_space<vmem>>, vector<1x1x1x32xf32>
    %17 = vector.shape_cast %16 : vector<1x1x1x32xf32> to vector<1x32xf32>
    %18 = vector.broadcast %17 : vector<1x32xf32> to vector<8x32xf32>
    %19 = arith.addf %15, %18 : vector<8x32xf32>
    %c0_19 = arith.constant 0 : index
    %c2 = arith.constant 2 : index
    %c0_20 = arith.constant 0 : index
    %c0_21 = arith.constant 0 : index
    %20 = vector.load %arg4[%c0_19, %c2, %c0_20, %c0_21] : memref<1x3x64x32xbf16, #tpu.memory_space<vmem>>, vector<1x1x64x32xbf16>
    %21 = vector.shape_cast %20 : vector<1x1x64x32xbf16> to vector<64x32xbf16>
    %cst_22 = arith.constant dense<0.000000e+00> : vector<8x32xf32>
    %22 = tpu.matmul %5, %21, %cst_22 {dimension_numbers = #tpu.dot_dimension_numbers<[1], [0], [0], [1], [0, 0, 1, 1], [], []>} : vector<8x64xbf16>, vector<64x32xbf16>, vector<8x32xf32> -> vector<8x32xf32>
    %c0_23 = arith.constant 0 : index
    %c2_24 = arith.constant 2 : index
    %c0_25 = arith.constant 0 : index
    %c0_26 = arith.constant 0 : index
    %23 = vector.load %arg5[%c0_23, %c2_24, %c0_25, %c0_26] : memref<1x3x1x32xf32, #tpu.memory_space<vmem>>, vector<1x1x1x32xf32>
    %24 = vector.shape_cast %23 : vector<1x1x1x32xf32> to vector<1x32xf32>
    %25 = vector.broadcast %24 : vector<1x32xf32> to vector<8x32xf32>
    %26 = arith.addf %22, %25 : vector<8x32xf32>
    %27 = arith.truncf %12 : vector<8x32xf32> to vector<8x32xbf16>
    %28 = arith.truncf %19 : vector<8x32xf32> to vector<8x32xbf16>
    %cst_27 = arith.constant dense<0.000000e+00> : vector<8x8xf32>
    %29 = tpu.matmul %27, %28, %cst_27 {dimension_numbers = #tpu.dot_dimension_numbers<[1], [1], [0], [0], [0, 0, 1, 0], [], []>} : vector<8x32xbf16>, vector<8x32xbf16>, vector<8x8xf32> -> vector<8x8xf32>
    %c0_28 = arith.constant 0 : index
    %c0_29 = arith.constant 0 : index
    %c0_30 = arith.constant 0 : index
    %30 = vector.load %arg3[%c0_28, %c0_29, %c0_30] : memref<1x1x8xf32, #tpu.memory_space<vmem>>, vector<1x1x8xf32>
    %31 = vector.shape_cast %30 : vector<1x1x8xf32> to vector<1x8xf32>
    %32 = vector.broadcast %31 : vector<1x8xf32> to vector<8x8xf32>
    %33 = arith.addf %29, %32 : vector<8x8xf32>
    %cst_31 = arith.constant dense<0xFF800000> : vector<8xf32>
    %34 = vector.multi_reduction <maximumf>, %33, %cst_31 [1] : vector<8x8xf32> to vector<8xf32>
    %35 = vector.shape_cast %34 : vector<8xf32> to vector<8x1xf32>
    %36 = vector.broadcast %35 : vector<8x1xf32> to vector<8x8xf32>
    %37 = arith.subf %33, %36 : vector<8x8xf32>
    %38 = math.exp %37 : vector<8x8xf32>
    %cst_32 = arith.constant dense<0.000000e+00> : vector<8xf32>
    %39 = vector.multi_reduction <add>, %38, %cst_32 [1] : vector<8x8xf32> to vector<8xf32>
    %40 = vector.shape_cast %39 : vector<8xf32> to vector<8x1xf32>
    %41 = arith.truncf %38 : vector<8x8xf32> to vector<8x8xbf16>
    %42 = arith.truncf %26 : vector<8x32xf32> to vector<8x32xbf16>
    %cst_33 = arith.constant dense<0.000000e+00> : vector<8x32xf32>
    %43 = tpu.matmul %41, %42, %cst_33 {dimension_numbers = #tpu.dot_dimension_numbers<[1], [0], [0], [1], [0, 0, 1, 1], [], []>} : vector<8x8xbf16>, vector<8x32xbf16>, vector<8x32xf32> -> vector<8x32xf32>
    %44 = tpu.reciprocal %40 {approx = true} : vector<8x1xf32> -> vector<8x1xf32>
    %45 = vector.broadcast %44 : vector<8x1xf32> to vector<8x32xf32>
    %46 = arith.mulf %43, %45 : vector<8x32xf32>
    %c0_34 = arith.constant 0 : index
    %c0_35 = arith.constant 0 : index
    %47 = vector.load %arg11[%c0_34, %c0_35] : memref<8x64xf32, #tpu.memory_space<vmem>>, vector<8x64xf32>
    %48 = arith.truncf %46 : vector<8x32xf32> to vector<8x32xbf16>
    %c0_36 = arith.constant 0 : index
    %c0_37 = arith.constant 0 : index
    %c0_38 = arith.constant 0 : index
    %49 = vector.load %arg6[%c0_36, %c0_37, %c0_38] : memref<1x32x64xbf16, #tpu.memory_space<vmem>>, vector<1x32x64xbf16>
    %50 = vector.shape_cast %49 : vector<1x32x64xbf16> to vector<32x64xbf16>
    %cst_39 = arith.constant dense<0.000000e+00> : vector<8x64xf32>
    %51 = tpu.matmul %48, %50, %cst_39 {dimension_numbers = #tpu.dot_dimension_numbers<[1], [0], [0], [1], [0, 0, 1, 1], [], []>} : vector<8x32xbf16>, vector<32x64xbf16>, vector<8x64xf32> -> vector<8x64xf32>
    %52 = arith.addf %47, %51 : vector<8x64xf32>
    %c0_40 = arith.constant 0 : index
    %c0_41 = arith.constant 0 : index
    %53 = vector.load %arg11[%c0_40, %c0_41] : memref<8x64xf32, #tpu.memory_space<vmem>>, vector<8x64xf32>
    tpu.vector_store %arg11[%c0_40, %c0_41], %52 {strides = array<i32>} : memref<8x64xf32, #tpu.memory_space<vmem>>, vector<8x64xf32>,
    %c1_i32 = arith.constant 1 : i32
    %54 = arith.cmpi eq, %arg1, %c1_i32 : i32
    %55 = arith.extui %54 : i1 to i32
    %c0_i32_42 = arith.constant 0 : i32
    %56 = arith.cmpi ne, %55, %c0_i32_42 : i32
    scf.if %56 {
      %c0_43 = arith.constant 0 : index
      %c0_44 = arith.constant 0 : index
      %c0_45 = arith.constant 0 : index
      %57 = vector.load %arg2[%c0_43, %c0_44, %c0_45] : memref<1x8x64xf32, #tpu.memory_space<vmem>>, vector<1x8x64xf32>
      %58 = vector.shape_cast %57 : vector<1x8x64xf32> to vector<8x64xf32>
      %c0_46 = arith.constant 0 : index
      %c0_47 = arith.constant 0 : index
      %59 = vector.load %arg11[%c0_46, %c0_47] : memref<8x64xf32, #tpu.memory_space<vmem>>, vector<8x64xf32>
      %60 = arith.addf %58, %59 : vector<8x64xf32>
      %c0_48 = arith.constant 0 : index
      %c0_49 = arith.constant 0 : index
      %61 = vector.load %arg7[%c0_48, %c0_49] : memref<1x64xf32, #tpu.memory_space<vmem>>, vector<1x64xf32>
      %62 = vector.broadcast %61 : vector<1x64xf32> to vector<8x64xf32>
      %63 = arith.addf %60, %62 : vector<8x64xf32>
      %cst_50 = arith.constant dense<0.000000e+00> : vector<8xf32>
      %64 = vector.multi_reduction <add>, %63, %cst_50 [1] : vector<8x64xf32> to vector<8xf32>
      %65 = vector.shape_cast %64 : vector<8xf32> to vector<8x1xf32>
      %cst_51 = arith.constant 6.400000e+01 : f32
      %66 = vector.broadcast %cst_51 : f32 to vector<8x1xf32>
      %67 = arith.divf %65, %66 : vector<8x1xf32>
      %68 = vector.broadcast %67 : vector<8x1xf32> to vector<8x64xf32>
      %69 = arith.subf %63, %68 : vector<8x64xf32>
      %70 = arith.mulf %69, %69 : vector<8x64xf32>
      %cst_52 = arith.constant dense<0.000000e+00> : vector<8xf32>
      %71 = vector.multi_reduction <add>, %70, %cst_52 [1] : vector<8x64xf32> to vector<8xf32>
      %72 = vector.shape_cast %71 : vector<8xf32> to vector<8x1xf32>
      %cst_53 = arith.constant 6.400000e+01 : f32
      %73 = vector.broadcast %cst_53 : f32 to vector<8x1xf32>
      %74 = arith.divf %72, %73 : vector<8x1xf32>
      %75 = vector.broadcast %67 : vector<8x1xf32> to vector<8x64xf32>
      %76 = arith.subf %63, %75 : vector<8x64xf32>
      %cst_54 = arith.constant 9.99999996E-13 : f32
      %77 = vector.broadcast %cst_54 : f32 to vector<8x1xf32>
      %78 = arith.addf %74, %77 : vector<8x1xf32>
      %79 = math.rsqrt %78 : vector<8x1xf32>
      %80 = vector.broadcast %79 : vector<8x1xf32> to vector<8x64xf32>
      %81 = arith.mulf %76, %80 : vector<8x64xf32>
      %c0_55 = arith.constant 0 : index
      %c0_56 = arith.constant 0 : index
      %82 = vector.load %arg8[%c0_55, %c0_56] : memref<1x64xf32, #tpu.memory_space<vmem>>, vector<1x64xf32>
      %83 = vector.broadcast %82 : vector<1x64xf32> to vector<8x64xf32>
      %84 = arith.mulf %81, %83 : vector<8x64xf32>
      %c0_57 = arith.constant 0 : index
      %c0_58 = arith.constant 0 : index
      %85 = vector.load %arg9[%c0_57, %c0_58] : memref<1x64xf32, #tpu.memory_space<vmem>>, vector<1x64xf32>
      %86 = vector.broadcast %85 : vector<1x64xf32> to vector<8x64xf32>
      %87 = arith.addf %84, %86 : vector<8x64xf32>
      %88 = arith.truncf %87 : vector<8x64xf32> to vector<8x64xbf16>
      %c0_59 = arith.constant 0 : index
      %c0_60 = arith.constant 0 : index
      %c0_61 = arith.constant 0 : index
      %89 = vector.load %arg10[%c0_59, %c0_60, %c0_61] : memref<1x8x64xbf16, #tpu.memory_space<vmem>>, vector<1x8x64xbf16>
      %90 = vector.shape_cast %89 : vector<1x8x64xbf16> to vector<8x64xbf16>
      %91 = vector.shape_cast %88 : vector<8x64xbf16> to vector<1x8x64xbf16>
      tpu.vector_store %arg10[%c0_59, %c0_60, %c0_61], %91 {strides = array<i32>} : memref<1x8x64xbf16, #tpu.memory_space<vmem>>, vector<1x8x64xbf16>,
    } else {
    }
    return
  }
  func.func @transform_0(%arg0: i32, %arg1: i32) -> (i32, i32, i32) {
    %c0_i32 = arith.constant 0 : i32
    %c0_i32_0 = arith.constant 0 : i32
    %c0_i32_1 = arith.constant 0 : i32
    return %arg0, %c0_i32, %c0_i32_0 : i32, i32, i32
  }
  func.func @transform_1(%arg0: i32, %arg1: i32) -> (i32, i32, i32) {
    %c0_i32 = arith.constant 0 : i32
    %c0_i32_0 = arith.constant 0 : i32
    %c0_i32_1 = arith.constant 0 : i32
    return %arg0, %c0_i32, %c0_i32_0 : i32, i32, i32
  }
  func.func @transform_2(%arg0: i32, %arg1: i32) -> (i32, i32, i32, i32) {
    %c0_i32 = arith.constant 0 : i32
    %c0_i32_0 = arith.constant 0 : i32
    %c0_i32_1 = arith.constant 0 : i32
    %c0_i32_2 = arith.constant 0 : i32
    return %arg1, %c0_i32, %c0_i32_0, %c0_i32_1 : i32, i32, i32, i32
  }
  func.func @transform_3(%arg0: i32, %arg1: i32) -> (i32, i32, i32, i32) {
    %c0_i32 = arith.constant 0 : i32
    %c0_i32_0 = arith.constant 0 : i32
    %c0_i32_1 = arith.constant 0 : i32
    %c0_i32_2 = arith.constant 0 : i32
    return %arg1, %c0_i32, %c0_i32_0, %c0_i32_1 : i32, i32, i32, i32
  }
  func.func @transform_4(%arg0: i32, %arg1: i32) -> (i32, i32, i32) {
    %c0_i32 = arith.constant 0 : i32
    %c0_i32_0 = arith.constant 0 : i32
    %c0_i32_1 = arith.constant 0 : i32
    return %arg1, %c0_i32, %c0_i32_0 : i32, i32, i32
  }
  func.func @transform_5(%arg0: i32, %arg1: i32) -> (i32, i32) {
    %c0_i32 = arith.constant 0 : i32
    %c0_i32_0 = arith.constant 0 : i32
    %c0_i32_1 = arith.constant 0 : i32
    return %c0_i32, %c0_i32_0 : i32, i32
  }
  func.func @transform_6(%arg0: i32, %arg1: i32) -> (i32, i32) {
    %c0_i32 = arith.constant 0 : i32
    %c0_i32_0 = arith.constant 0 : i32
    %c0_i32_1 = arith.constant 0 : i32
    return %c0_i32, %c0_i32_0 : i32, i32
  }
  func.func @transform_7(%arg0: i32, %arg1: i32) -> (i32, i32) {
    %c0_i32 = arith.constant 0 : i32
    %c0_i32_0 = arith.constant 0 : i32
    %c0_i32_1 = arith.constant 0 : i32
    return %c0_i32, %c0_i32_0 : i32, i32
  }
  func.func @transform_8(%arg0: i32, %arg1: i32) -> (i32, i32, i32) {
    %c0_i32 = arith.constant 0 : i32
    %c0_i32_0 = arith.constant 0 : i32
    %c0_i32_1 = arith.constant 0 : i32
    return %arg0, %c0_i32, %c0_i32_0 : i32, i32, i32
  }
}

</mosaic_0001>

<bundles_post_ra>
// kernel: tpu_custom_call.1
= control target key start
LH: loop header
LB: loop body
LE: loop exit
PB: predicated region body
PF: predicated region fallthrough
CT: control target
= control target key end

     0   :  { %s1614_s0 = inlined_call_operand.vmem [shape: f32[2,8,64], index: 0, kind: input, shape index: {}]   ;;  %s1615_s1 = inlined_call_operand.vmem [shape: f32[2,1,8], index: 1, kind: input, shape index: {}]   ;;  %s1616_s2 = inlined_call_operand.vmem [shape: bf16[2,3,64,32], index: 2, kind: input, shape index: {}]   ;;  %s1617_s3 = inlined_call_operand.vmem [shape: f32[2,3,1,32], index: 3, kind: input, shape index: {}]   ;;  %s1618_s4 = inlined_call_operand.vmem [shape: bf16[2,32,64], index: 4, kind: input, shape index: {}]   ;;  %s1619_s5 = inlined_call_operand.vmem [shape: f32[1,64], index: 5, kind: input, shape index: {}]   ;;  %s1620_s6 = inlined_call_operand.vmem [shape: f32[1,64], index: 6, kind: input, shape index: {}]   ;;  %s1621_s7 = inlined_call_operand.vmem [shape: f32[1,64], index: 7, kind: input, shape index: {}]   ;;  %s1622_s8 = inlined_call_operand.hbm [shape: bf16[2,8,64], index: 8, kind: output, shape index: {}]  }
   0x1   :  { %1633 = sst [smem:[#allocation15_spill]] %s1622_s8 }
   0x2   :  { %13 = vsyncpa [#allocation4], 0 }
   0x3   :  { %15 = vsyncpa [#allocation4 + $0x1], 0  ;;  %s1376_s27 = smov 0   ;;  %s1378_s28 = smov 0  }
   0x4   :  { %s1380_s29 = smov 0   ;;  %s1382_s30 = smov 0  }
   0x5   :  { %s1384_s9 = smov 0   ;;  %s1386_s10 = smov 0  }
   0x6   :  { %s1388_s11 = smov 0   ;;  %s1390_s12 = smov 0  }
   0x7 LB: > { %1634 = sst [smem:[#allocation6_spill]] %s1297_s27  ;;  %s995_s13 = sadd.s32 4294967295, %s1325_s12   ;;  %s1325_s12 = sphi %s1390_s12, %s21_s12   ;;  %s1321_s11 = sphi %s1388_s11, %s1656_s11   ;;  %s1317_s10 = sphi %s1386_s10, %s1655_s10   ;;  %s1313_s9 = sphi %s1384_s9, %s1654_s9   ;;  %s1309_s30 = sphi %s1382_s30, %s1653_s30   ;;  %s1305_s29 = sphi %s1380_s29, %s1652_s29   ;;  %s1301_s28 = sphi %s1378_s28, %s1658_s28   ;;  %s1297_s27 = sphi %s1376_s27, %s1657_s27  }
   0x8   : > { %1635 = sst [smem:[#allocation7_spill]] %s1305_s29  ;;  %s996_s14 = sadd.s32 4294967294, %s1325_s12  }
   0x9   : > { %1636 = sst [smem:[#allocation8_spill]] %s1317_s10  ;;  %s30_s15 = sadd.s32 1, %s1317_s10 }
   0xa   : > { %1637 = sst [smem:[#allocation9_spill]] %s1321_s11  ;;  %p31_p0 = scmp.ge.s32.totalorder %s30_s15, 2 }
   0xb   : > { %1638 = sst [smem:[#allocation10_spill]] %s1325_s12  ;;  %s33_s16 = sadd.s32 1, %s1321_s11 }
   0xc   : > { %p243_p1 = scmp.ne.s32.totalorder %s1305_s29, %s1301_s28  ;;  %p244_p2 = scmp.eq.s32.totalorder %s995_s13, 3 }
   0xd   : > { %s1660_s15 = smov (%p31_p0, %s30_s15), 0  ;;  %s1662_s16 = smov (!%p31_p0, %s33_s16), %s1321_s11 }
   0xe   : > { %1639 = sst [smem:[#allocation11_spill]] %s1660_s15  ;;  %p1425_p3 = por %p244_p2, %p243_p1 }
   0xf   : > { %p249_p4 = scmp.ne.s32.totalorder %s1301_s28, %s1297_s27  ;;  %p35_p5 = scmp.ge.s32.totalorder %s1662_s16, 2 }
  0x10   : > { %p250_p6 = scmp.eq.s32.totalorder %s996_s14, 3  ;;  %p999_p7 = scmp.ge.s32.totalorder %s1325_s12, 1 }
  0x11   : > { %p313_p8 = scmp.lt.s32.totalorder %s1325_s12, 5  ;;  %s1664_s16 = smov (%p35_p5, %s1662_s16), 0 }
  0x12   : > { %1641 = sst [smem:[#allocation12_spill]] %s1664_s16  ;;  %p1435_p9 = por %p250_p6, %p249_p4 }
  0x13   : > { %p314_p10 = pnand %p999_p7, %p313_p8  ;;  %s230_s19 = ssub.s32 %s1321_s11, %s1664_s16 }
  0x14   : > { %s1642_s18 = scalar_select %p1435_p9, 1, 0 }
  0x15   : > { %s233_s20 = sadd.s32 1, %s1305_s29  ;;  %p231_p11 = scmp.eq.s32.totalorder %s230_s19, 0 }
  0x16   : > { %1643 = sst [smem:[#allocation13_spill]] %s1642_s18  ;;  %317 = sbr.rel (%p314_p10) target bundleno = 1437 (0x59d), region = 52 }
  0x17   : > { %s1443_s21 = scalar_select %p231_p11, %s1305_s29, %s233_s20  }
  0x18   : > { %s1625_s22 = sand.u32 (!%p314_p10), 1, %s1301_s28   ;;  %p363_p12 = scmp.lt.s32.totalorder (!%p314_p10), %s1313_s9, 1 }
  0x19   : > { %1644 = sst [smem:[#allocation14_spill]] %s1443_s21  ;;  %s1449_s23 = sshll.u32 (!%p314_p10), %s1625_s22, 2 }
  0x1a   : > { %p370_p13 = scmp.lt.s32.totalorder (!%p314_p10), %s1309_s30, 1  ;;  %s362_s16 = scalar_lea.vmem (!%p314_p10), [#allocation3], %s1449_s23 }
  0x1b   : > { %p1005_p0 = scmp.ne.s32.totalorder (!%p314_p10), %s1309_s30, 0 }
  0x1d   : > { %s1453_s24 = scalar_select %p363_p12, %s1313_s9, 1 }
  0x1e   : > { %s371_s25 = scalar_select %p370_p13, %s1309_s30, 1 }
  0x1f   : > { %s1001_s26 = sshll.u32 %s1453_s24, 3  ;;  %388 = sbr.rel (%p1005_p0) target bundleno = 38 (0x26), region = 56  ;;  %vm389_vm0 = vcmask (!%p1005_p0), 523264   ;;  %v1327_v0 = vmov (!%p1005_p0), 0.0  }
  0x20   : > { %s1464_s15 = scalar_lea.vmem %s1614_s0, %s1001_s26  ;;  %s1135_s11 = smul.u32 96, %s371_s25  ;;  %390 = vst.msk [vmem:[#allocation2] sm:$0xff] (!%p1005_p0), %vm389_vm0, %v1327_v0 }
  0x21   : > { %s1136_s22 = smul.u32 3, %s371_s25  ;;  %s1056_s10 = sshll.u32 %s371_s25, 4 }
  0x22   : > { %s1469_s18 = scalar_lea.vmem %s1616_s2, %s1135_s11  ;;  %s1474_s8 = scalar_lea.vmem %s1618_s4, %s1056_s10 }
  0x23   : > { %s1479_s19 = scalar_lea.vmem %s1617_s3, %s1136_s22 }
  0x26 PF: > { %v1211_v1 = vld [vmem:[%s1469_s18 + $0x20] sm:$0xff]   ;;  %v1328_v2 = vmov 0.0   ;;  %v1212_v3 = vld [vmem:[%s1469_s18 + $0x28] sm:$0xff]   ;;  %vm1329_vm1 = vmmov 0   ;;  %v1214_v6 = vld [vmem:[%s1469_s18 + $0x30] sm:$0xff]   ;;  %vm432_vm2 = vcmask 523264   ;;  %s1645_s10 = scalar_lea.vmem %s1615_s1, %s1453_s24 }
  0x27   : > { %1091 = vmatprep.subr.bf16.mxu1 %v1328_v2  ;;  %1079 = vmatprep.subr.bf16.mxu0 %v1328_v2  ;;  %v1213_v4 = vld [vmem:[%s1469_s18] sm:$0xff]   ;;  %v1215_v5 = vld [vmem:[%s1469_s18 + $0x8] sm:$0xff]   ;;  %v1216_v7 = vld [vmem:[%s1469_s18 + $0x38] sm:$0xff]   ;;  %vm647_vm3 = vcmask 261120   ;;  %vm694_vm4 = vcmask 64512   ;;  %vm709_vm5 = vcmask 1043456  }
  0x28   : > { %1092 = vmatpush3.bf16.msra.mxu1 %v1211_v1  ;;  %1099 = vmatprep.mubr.msk.bf16.mxu1 %vm1329_vm1, %v1328_v2  ;;  %v1217_v8 = vld [vmem:[%s1469_s18 + $0x10] sm:$0xff]   ;;  %v391_v9 = vld [vmem:[%s1464_s15] sm:$0xff]  ;;  %v1218_v10 = vld [vmem:[%s1469_s18 + $0x18] sm:$0xff]   ;;  %p1048_p1 = scmp.ne.s32.totalorder %s1309_s30, 1 }
  0x29   : > { %1093 = vmatprep.subr.bf16.mxu1 %v1328_v2  ;;  %1087 = vmatprep.mubr.msk.bf16.mxu0 %vm1329_vm1, %v1328_v2  ;;  %v392_v11 = vpack.c.bf16 %v391_v9, %v391_v9  ;;  %v1219_v12 = vld [vmem:[%s1469_s18 + $0x40] sm:$0xff]   ;;  %v1220_v13 = vld [vmem:[%s1469_s18 + $0x48] sm:$0xff]   ;;  %v1221_v14 = vld [vmem:[%s1469_s18 + $0x50] sm:$0xff]   ;;  %vm864_vm6 = vcmask (!%p1048_p1), 519168  }
  0x2a   : > { %1080 = vmatpush3.bf16.msra.mxu0 %v1213_v4  ;;  %v1222_v15 = vld [vmem:[%s1469_s18 + $0x58] sm:$0xff]   ;;  %v1021_v16 = vld [vmem:[%s1479_s19 + $0x1] ss:$0 sm:$0xff]  ;;  %v1006_v21 = vld [vmem:[%s1479_s19] ss:$0 sm:$0xff] }
  0x2b   : > { %1081 = vmatprep.subr.bf16.mxu0 %v1328_v2  ;;  %v1042_v31 = vld [vmem:[%s1645_s10] ss:$0 sm:$0xff]  ;;  %v1036_v38 = vld [vmem:[%s1479_s19 + $0x2] ss:$0 sm:$0xff]  ;;  %v1224_v53 = vld [vmem:[%s1474_s8 + $0x8] sm:$0xff]  }
  0x2c   : > { %1094 = vmatpush3.bf16.msra.mxu1 %v1212_v3  ;;  %v1223_v52 = vld [vmem:[%s1474_s8] sm:$0xff]  }
  0x2d   : > { %1095 = vmatprep.subr.bf16.mxu1 %v1328_v2  ;;  %v755_v62 = vld [vmem:[#allocation2] sm:$0xff] }
  0x2e   : > { %1082 = vmatpush3.bf16.msra.mxu0 %v1215_v5  ;;  %v822_v4 = vld [vmem:[%s1464_s15] sm:$0xff] (!%p1048_p1) }
  0x2f   : > { %1083 = vmatprep.subr.bf16.mxu0 %v1328_v2 }
  0x30   : > { %1096 = vmatpush3.bf16.msra.mxu1 %v1214_v6  ;;  %v1049_v6 = vld [vmem:[%s1619_s5] ss:$0 sm:$0xff] (!%p1048_p1) }
  0x31   : > { %1097 = vmatprep.subr.bf16.mxu1 %v1328_v2 }
  0x32   : > { %1084 = vmatpush3.bf16.msra.mxu0 %v1217_v8 }
  0x33   : > { %1085 = vmatprep.subr.bf16.mxu0 %v1328_v2 }
  0x34   : > { %1098 = vmatpush3.bf16.msra.mxu1 %v1216_v7 }
  0x35   : > { %1115 = vmatprep.subr.bf16.mxu1 %v1328_v2 }
  0x36   : > { %1086 = vmatpush3.bf16.msra.mxu0 %v1218_v10 }
  0x37   : > { %1100 = vmatmul.mubr.msk.bf16.vlgmr.msra.gmra.mrb[0].mxu1 %vm432_vm2, %v392_v11  ;;  %1103 = vmatprep.subr.bf16.mxu0 %v1328_v2 }
  0x38   : > { %1117 = vmatprep.mubr.msk.bf16.mxu1 %vm1329_vm1, %v1328_v2 }
  0x39   : > { %1088 = vmatmul.mubr.msk.bf16.vlgmr.msra.gmra.mrb[0].mxu0 %vm432_vm2, %v392_v11 }
  0x3a   : > { %1111 = vmatprep.mubr.msk.bf16.mxu0 %vm1329_vm1, %v1328_v2  ;;  %1104 = vmatpush3.bf16.msra.mxu0 %v1219_v12 }
  0x3b   : > { %1105 = vmatprep.subr.bf16.mxu0 %v1328_v2 }
  0x3e   : > { %1106 = vmatpush3.bf16.msra.mxu0 %v1220_v13 }
  0x3f   : > { %1107 = vmatprep.subr.bf16.mxu0 %v1328_v2 }
  0x42   : > { %1108 = vmatpush3.bf16.msra.mxu0 %v1221_v14 }
  0x43   : > { %1109 = vmatprep.subr.bf16.mxu0 %v1328_v2 }
  0x46   : > { %1110 = vmatpush3.bf16.msra.mxu0 %v1222_v15 }
  0x47   : > { %1127 = vmatprep.subr.bf16.mxu0 %v1328_v2 }
  0x49   : > { %1112 = vmatmul.mubr.msk.bf16.vlgmr.msra.gmra.mrb[4].mxu0 %vm432_vm2, %v392_v11 }
  0x4a   : > { %1131 = vmatprep.mubr.msk.bf16.mxu0 %vm1329_vm1, %v1328_v2  ;;  %1128 = vmatpush3.bf16.msra.mxu0 %v1223_v52 }
  0x4b   : > { %1129 = vmatprep.subr.bf16.mxu0 %v1328_v2 }
  0x4e   : > { %1130 = vmatpush3.bf16.msra.mxu0 %v1224_v53 }
 0x10a   : > { %v551_v17 = vpop.f32.mrb[0].mxu1 }
 0x10b   : > { %v552_v18 = vadd.f32 %v1021_v16, %v551_v17  ;;  %v1101_v19 = vpop.f32.mrb[1].mxu1 }
 0x10c   : > { %v554_v20 = vpop.f32.mrb[2].mxu1  ;;  %v470_v22 = vpop.f32.mrb[0].mxu0  ;;  %v1050_v19 = vld [vmem:[%s1620_s6] ss:$0 sm:$0xff] (!%p1048_p1) }
 0x10d   : > { %v639_v23 = vpack.c.bf16 %v552_v18, %v552_v18  ;;  %v1102_v24 = vpop.f32.mrb[3].mxu1  ;;  %v1089_v25 = vpop.f32.mrb[1].mxu0  ;;  %v471_v28 = vadd.f32 %v1006_v21, %v470_v22  ;;  %v1051_v21 = vld [vmem:[%s1621_s7] ss:$0 sm:$0xff] (!%p1048_p1) }
 0x10e   : > { %v473_v26 = vpop.f32.mrb[2].mxu0 }
 0x10f   : > { %v652_v27 = vsel %vm647_vm3, %v639_v23, 0  ;;  %v1090_v29 = vpop.f32.mrb[3].mxu0  ;;  %v638_v30 = vpack.c.bf16 %v471_v28, %v471_v28 }
 0x110   : > { %1116 = vmatpush3.bf16.xpose.msra.mxu1 %v652_v27 }
 0x111   : > { %1121 = vmatprep.subr.bf16.mxu1 %v1328_v2 }
 0x117   : > { %1118 = vmatmul.mubr.msk.bf16.vlgmr.msra.gmra.mrb[4].mxu1 %vm647_vm3, %v638_v30 }
 0x118   : > { %1123 = vmatprep.mubr.msk.bf16.mxu1 %vm1329_vm1, %v1328_v2 }
 0x11c   : > { %v632_v39 = vpop.f32.mrb[4].mxu0 }
 0x11d   : > { %v633_v40 = vadd.f32 %v1036_v38, %v632_v39  ;;  %v1113_v41 = vpop.f32.mrb[5].mxu0 }
 0x11e   : > { %v635_v42 = vpop.f32.mrb[6].mxu0 }
 0x11f   : > { %v705_v43 = vpack.c.bf16 %v633_v40, %v633_v40  ;;  %v1114_v44 = vpop.f32.mrb[7].mxu0 }
 0x121   : > { %v711_v45 = vsel %vm709_vm5, %v705_v43, 0 }
 0x122   : > { %1122 = vmatpush3.bf16.msra.mxu1 %v711_v45 }
 0x1ea   : > { %v688_v32 = vpop.f32.mrb[4].mxu1 }
 0x1eb   : > { %v689_v33 = vadd.f32 %v1042_v31, %v688_v32  ;;  %v1119_v34 = vpop.f32.mrb[5].mxu1 }
 0x1ec   : > { %v691_v35 = vpop.f32.mrb[6].mxu1 }
 0x1ed   : > { %v1120_v36 = vpop.f32.mrb[7].mxu1  ;;  %v695_v37 = vsel %vm694_vm4, %v689_v33, -inf }
 0x1ee   : > { %696 = vmax.xlane.f32.xlu0 %v695_v37 }
 0x27b   : > { %v697_v46 = vpop.xlane.xlu0 %696 }
 0x27c   : > { %v698_v47 = vsub.f32 %v689_v33, %v697_v46 }
 0x27e   : > { %v699_v48 = vmul.f32 1.442695, %v698_v47 }
 0x280   : > { %1225 = vpow2.f32 %v699_v48 }
 0x28a   : > { %v1226_v49 = vpop.eup %1225 }
 0x28b   : > { %v701_v50 = vsel %vm694_vm4, %v1226_v49, 0.0  ;;  %v704_v51 = vpack.c.bf16 %v1226_v49, %v1226_v49 }
 0x28c   : > { %702 = vadd.xlane.f32.xlu0 %v701_v50 }
 0x28d   : > { %1124 = vmatmul.mubr.msk.bf16.vlgmr.msra.gmra.mrb[8].mxu1 %vm694_vm4, %v704_v51 }
 0x319   : > { %v703_v54 = vpop.xlane.xlu0 %702 }
 0x31a   : > { %1227 = vrcp.f32 %v703_v54 }
 0x324   : > { %v1228_v55 = vpop.eup %1227 }
 0x360   : > { %v747_v56 = vpop.f32.mrb[8].mxu1 }
 0x361   : > { %v754_v57 = vmul.f32 %v1228_v55, %v747_v56  ;;  %v1125_v58 = vpop.f32.mrb[9].mxu1 }
 0x362   : > { %v750_v59 = vpop.f32.mrb[10].mxu1 }
 0x363   : > { %v756_v60 = vpack.c.bf16 %v754_v57, %v754_v57  ;;  %v1126_v61 = vpop.f32.mrb[11].mxu1 }
 0x365   : > { %1132 = vmatmul.mubr.msk.bf16.vlgmr.msra.gmra.mrb[8].mxu0 %vm647_vm3, %v756_v60 }
 0x435   : > { %821 = sbr.rel (%p1048_p1) target bundleno = 1411 (0x583), region = 60 }
 0x438   : > { %v810_v63 = vpop.f32.mrb[8].mxu0 }
 0x439   : > { %v816_v0 = vadd.f32 %v810_v63, %v755_v62  ;;  %v1133_v1 = vpop.f32.mrb[9].mxu0 }
 0x43a   : > { %v813_v3 = vpop.f32.mrb[10].mxu0 }
 0x43b   : > { %817 = vst.msk [vmem:[#allocation2] sm:$0xff] %vm432_vm2, %v816_v0  ;;  %v1134_v2 = vpop.f32.mrb[11].mxu0 }
 0x442   : > { %v823_v5 = vld [vmem:[#allocation2] sm:$0xff] }
 0x443   : > { %v824_v7 = vadd.f32 %v823_v5, %v822_v4 }
 0x445   : > { %v832_v8 = vadd.f32 %v1049_v6, %v824_v7 }
 0x447   : > { %v833_v9 = vsel %vm432_vm2, %v832_v8, 0.0 }
 0x448   : > { %834 = vadd.xlane.f32.xlu0 %v833_v9 }
 0x4d5   : > { %v835_v10 = vpop.xlane.xlu0 %834 }
 0x4d6   : > { %v837_v11 = vmul.f32 0.015625, %v835_v10 }
 0x4d8   : > { %v838_v12 = vsub.f32 %v832_v8, %v837_v11 }
 0x4da   : > { %v839_v13 = vmul.f32 %v838_v12, %v838_v12 }
 0x4dc   : > { %v840_v14 = vsel %vm432_vm2, %v839_v13, 0.0 }
 0x4dd   : > { %841 = vadd.xlane.f32.xlu0 %v840_v14 }
 0x56a   : > { %v842_v15 = vpop.xlane.xlu0 %841 }
 0x56b   : > { %v843_v16 = vmul.f32 0.015625, %v842_v15 }
 0x56d   : > { %v844_v17 = vadd.f32 1e-12, %v843_v16 }
 0x56f   : > { %1229 = vrsqrt.f32 %v844_v17 }
 0x579   : > { %v1230_v18 = vpop.eup %1229 }
 0x57a   : > { %v846_v20 = vmul.f32 %v1230_v18, %v838_v12 }
 0x57c   : > { %v854_v22 = vmul.f32 %v1050_v19, %v846_v20 }
 0x57e   : > { %v862_v23 = vadd.f32 %v1051_v21, %v854_v22 }
 0x580   : > { %v863_v24 = vpack.c.bf16 %v862_v23, %v862_v23 }
 0x582   : > { %865 = vst.msk [vmem:[%s362_s16] sm:$0xf] %vm864_vm6, %v863_v24 }
 0x583 PF: > { %s1053_s21 = sshll.u32 %s1313_s9, 6  ;;  %s1646_s25 = sld [smem:[#allocation15_spill]] }
 0x584   : > { %s880_s19 = sshll.u32 %s362_s16, 4  ;;  %s1647_s20 = sand.u32 1, %s1301_s28   ;;  %s881_s19 = int_to_ptr.vmem [resolvable:$true] %s880_s19 }
 0x585   : > { %s867_s13 = scalar_lea.sflag [#allocation4], %s1647_s20  ;;  %s1231_s14 = scalar_lea.vmem %s881_s19, 64 }
 0x586   : > { %p1232_p2 = scmp.ne.s32.totalorder %s881_s19, %s1231_s14  ;;  %s1330_s27 = smov [#allocation3]  }
 0x587   : > { %s1235_s29 = sshll.u32 %s1330_s27, 4  ;;  %s1236_s29 = int_to_ptr.vmem [resolvable:$false] %s1235_s29 }
 0x588   : > { %p1233_p4 = pnand %p1232_p2, %p1425_p3  ;;  %s1237_s10 = scalar_lea.vmem %s1236_s29, 128 }
 0x589   : > { %s1563_s26 = scalar_lea.hbm %s1646_s25, %s1053_s21  ;;  %p1238_p6 = scmp.lt.s32.totalorder %s881_s19, %s1236_s29 }
 0x58a   : > { %p1234_p5 = pneg %p1233_p4  ;;  %p1239_p7 = scmp.lt.s32.totalorder %s1237_s10, %s1231_s14 }
 0x58c   : > { %p1240_p8 = por %p1239_p7, %p1238_p6 }
 0x58e   : > { %p1241_p10 = pnand %p1240_p8, %p1234_p5 }
 0x590   : > { %1244 = shalt.err (!%p1241_p10)
}
 0x591   : > { %s1245_s9 = scalar_lea.hbm %s1563_s26, 64  ;;  %s1249_s8 = scalar_lea.hbm %s1646_s25, 128 }
 0x592   : > { %p1246_p11 = scmp.ne.s32.totalorder %s1563_s26, %s1245_s9  ;;  %p1250_p0 = scmp.lt.u32.totalorder %s1563_s26, %s1646_s25 }
 0x593   : > { %p1251_p1 = scmp.lt.u32.totalorder %s1249_s8, %s1245_s9  ;;  %p1253_p4 = scmp.lt.u32.totalorder %s1245_s9, %s1563_s26 }
 0x594   : > { %p1247_p12 = pnand %p1246_p11, %p1425_p3 }
 0x595   : > { %p1252_p2 = por %p1251_p1, %p1250_p0 }
 0x596   : > { %p1248_p13 = pneg %p1247_p12 }
 0x597   : > { %p1254_p5 = por %p1253_p4, %p1252_p2 }
 0x599   : > { %p1255_p6 = pnand %p1254_p5, %p1248_p13 }
 0x59b   : > { %1258 = shalt.err (!%p1255_p6)
}
 0x59c   : > { %1137 = dma.vmem_to_hbm [thread:$0]  (%p1425_p3), %s881_s19, 64, %s1563_s26, %s867_s13  }
 0x59d PF: > { %s1648_s12 = sld [smem:[#allocation10_spill]]  ;;  %s1649_s15 = sld [smem:[#allocation6_spill]] }
 0x5a3   : > { %p1143_p7 = scmp.ge.s32.totalorder %s1648_s12, 2  ;;  %s892_s21 = sand.u32 1, %s1649_s15  }
 0x5a4   : > { %s893_s22 = scalar_lea.sflag [#allocation4], %s892_s21 }
 0x5a5   : > { %p1140_p8 = pnand %p1143_p7, %p1435_p9 }
 0x5a7   : > { %1292 = dma.done.wait (!%p1140_p8), %s893_s22, 64  }
 0x5a8   : > { %1294 = vsyncadd (!%p1140_p8), %s893_s22, 4294967232  ;;  %s21_s12 = sadd.s32 1, %s1648_s12   ;;  %s1651_s24 = sld [smem:[#allocation7_spill]] }
 0x5a9   : > { %p18_p10 = scmp.ge.s32.totalorder %s21_s12, 6   ;;  %s1652_s29 = sld [smem:[#allocation14_spill]] }
 0x5aa   : > { %s1653_s30 = sld [smem:[#allocation8_spill]]  ;;  %s1654_s9 = sld [smem:[#allocation9_spill]] }
 0x5ab   : > { %s1655_s10 = sld [smem:[#allocation11_spill]]  ;;  %s1656_s11 = sld [smem:[#allocation12_spill]] }
 0x5ac   : > { %s1657_s27 = smov %s1301_s28  ;;  %20 = sbr.rel (!%p18_p10) target bundleno = 7 (0x7), region = 111 }
 0x5ae   : > { %s1658_s28 = smov %s1651_s24 }
 0x5b3   :  { %898 = vsyncpa [#allocation4], 1 }
 0x5b4   :  { %900 = vsyncpa [#allocation4 + $0x1], 1 }

</bundles_post_ra>
